<compile_context>
chip_gen: v7x
topology: tpu7x:2x2x1
jax: 0.10.0
libtpu: 0.0.40
codegen_flags: <defaults>
</compile_context>

<pallas_src>
import functools

import jax
import jax.numpy as jnp
from jax import lax
from jax.experimental import pallas as pl
from jax.experimental.pallas import tpu as pltpu


# ---------------------------------------------------------------------------
# Fused kernel: conv3x3+ReLU -> conv3x3+ReLU -> ConvT(4,3,s=2,p=1,op=1)+ReLU
# ---------------------------------------------------------------------------
def _fused_upsample1_kernel(x_ref, mask_ref, w1_ref, b1_ref, w2_ref, b2_ref,
                            wu_ref, bu_ref, o_ref, *, rows_keep):
    """One image-slab per grid step.

    x_ref   : (1, M, W*2C)   lane-dense input slab; rows k*(H+1) and the tail
                             rows are all-zero pad/separator rows.
    mask_ref: (M, 1)         1.0 on real image rows, 0.0 on pad/separator rows.
    w1_ref  : (3, W*2C, W*C) bf16 block-banded lane-conv weights (per kh).
    b1_ref  : (1, W*C)       f32 bias row (bias tiled over W).
    w2_ref  : (3, W*C, W*C)  bf16 lane-conv weights for conv2.
    b2_ref  : (1, W*C)       f32 bias row.
    wu_ref  : (2, W*C, 2*(2W*C2)) bf16 upconv phase weights; output lanes are
                             [odd-parity rows | even-parity rows].
    bu_ref  : (1, 2*(2W*C2)) f32 bias row.
    o_ref   : (1, rows_keep, 2*(2W*C2)) ; row s = [odd_{r-1} | even_r].
    """
    f32, bf16 = jnp.float32, jnp.bfloat16
    x = x_ref[0]                       # (M, L1) f32
    mask = mask_ref[...]               # (M, 1)  f32
    m = x.shape[0]

    def conv3x3_relu(a, w_ref, b_ref):
        # Rows above/below via XLU roll.  The wrapped rows are the slab's
        # all-zero boundary rows, so the wrap-around is already correct.
        up = pltpu.roll(a, shift=1, axis=0)        # up[s] = a[s-1]
        dn = pltpu.roll(a, shift=m - 1, axis=0)    # dn[s] = a[s+1]
        acc = jnp.dot(up.astype(bf16), w_ref[0], preferred_element_type=f32)
        acc = acc + jnp.dot(a.astype(bf16), w_ref[1],
                            preferred_element_type=f32)
        acc = acc + jnp.dot(dn.astype(bf16), w_ref[2],
                            preferred_element_type=f32)
        # ReLU, then explicitly re-zero the pad/separator rows: they are the
        # vertical zero padding consumed by the next stage.
        return jnp.maximum(acc + b_ref[...], 0.0) * mask

    h1 = conv3x3_relu(x, w1_ref, b1_ref)           # (M, L2)
    h2 = conv3x3_relu(h1, w2_ref, b2_ref)          # (M, L2)

    # ConvTranspose2d(C, C//2, (4,3), stride=2, pad=1, out_pad=1) + ReLU:
    # two wide matmuls; row s of `y` = [odd_out_{r-1} | even_out_r].
    nxt = pltpu.roll(h2, shift=m - 1, axis=0)      # nxt[s] = h2[s+1]
    y = jnp.dot(h2.astype(bf16), wu_ref[0], preferred_element_type=f32)
    y = y + jnp.dot(nxt.astype(bf16), wu_ref[1], preferred_element_type=f32)
    y = jnp.maximum(y + bu_ref[...], 0.0)
    o_ref[0] = y[:rows_keep].astype(o_ref.dtype)


def _fused_call(x_slab, mask, w1m, b1row, w2m, b2row, wum, burow, *, rows_keep):
    g, m_pad, l1 = x_slab.shape
    l2 = w1m.shape[2]
    lo2 = wum.shape[2]
    kernel = functools.partial(_fused_upsample1_kernel, rows_keep=rows_keep)
    return pl.pallas_call(
        kernel,
        out_shape=jax.ShapeDtypeStruct((g, rows_keep, lo2), jnp.float32),
        grid=(g,),
        in_specs=[
            pl.BlockSpec((1, m_pad, l1), lambda i: (i, 0, 0)),
            pl.BlockSpec((m_pad, 1), lambda i: (0, 0)),
            pl.BlockSpec((3, l1, l2), lambda i: (0, 0, 0)),
            pl.BlockSpec((1, l2), lambda i: (0, 0)),
            pl.BlockSpec((3, l2, l2), lambda i: (0, 0, 0)),
            pl.BlockSpec((1, l2), lambda i: (0, 0)),
            pl.BlockSpec((2, l2, lo2), lambda i: (0, 0, 0)),
            pl.BlockSpec((1, lo2), lambda i: (0, 0)),
        ],
        out_specs=pl.BlockSpec((1, rows_keep, lo2), lambda i: (i, 0, 0)),
        compiler_params=pltpu.CompilerParams(
            dimension_semantics=("parallel",)),
    )(x_slab, mask, w1m, b1row, w2m, b2row, wum, burow)


# ---------------------------------------------------------------------------
# Weight preprocessing (done once, outside the hot path)
# ---------------------------------------------------------------------------
def _make_same_lane_weights(w_hwio, width):
    """Fold width taps + channel contraction of a 'same' conv into per-kh
    block-banded matrices: out_row[h] = sum_kh padded_in_row[h+kh] @ M[kh].

    w_hwio: (KH, KW, Cin, Cout) -> (KH, width*Cin, width*Cout), float32.
    """
    kh_n, kw_n, cin, cout = w_hwio.shape
    pad = kw_n // 2
    mats = []
    for kh in range(kh_n):
        m = jnp.zeros((width * cin, width * cout), jnp.float32)
        for kw in range(kw_n):
            dj = kw - pad                        # input col = output col + dj
            w_lo = max(0, -dj)
            w_hi = min(width, width - dj)
            nblk = w_hi - w_lo
            eye = jnp.eye(nblk, dtype=jnp.float32)
            blk = jnp.einsum('uv,io->uivo', eye,
                             w_hwio[kh, kw].astype(jnp.float32))
            blk = blk.reshape(nblk * cin, nblk * cout)
            r0 = (w_lo + dj) * cin
            c0 = w_lo * cout
            m = m.at[r0:r0 + nblk * cin, c0:c0 + nblk * cout].add(blk)
        mats.append(m)
    return jnp.stack(mats)


def _make_up_lane_weight(w_center, w_left, w_right, width):
    """Phase weight for the stride-2 transposed conv (one input-row offset).

    Maps an input row in (j*C + ci) lane layout to a full output row in
    (q*C2 + co) lane layout, q in [0, 2*width):
        q = 2b   <- x[:, b]   * w_center
        q = 2b+1 <- x[:, b]   * w_left  +  x[:, b+1] * w_right  (b+1 < width)
    """
    c, c2 = w_center.shape
    j = jnp.arange(width)[:, None]
    q = jnp.arange(2 * width)[None, :]
    p_even = (q == 2 * j).astype(jnp.float32)       # j = b   -> q = 2b
    p_oddl = (q == 2 * j + 1).astype(jnp.float32)   # j = b   -> q = 2b+1
    p_oddr = (q == 2 * j - 1).astype(jnp.float32)   # j = b+1 -> q = 2b+1
    m4 = (jnp.einsum('jq,io->jiqo', p_even, w_center.astype(jnp.float32))
          + jnp.einsum('jq,io->jiqo', p_oddl, w_left.astype(jnp.float32))
          + jnp.einsum('jq,io->jiqo', p_oddr, w_right.astype(jnp.float32)))
    return m4.reshape(width * c, 2 * width * c2)


def prepare_params(params, width):
    """Precompute lane-dense bf16 weight matrices and f32 bias rows."""
    w1, b1, w2, b2, wt, bt = params
    c = w1.shape[-1]
    c2 = wt.shape[1]
    w1m = _make_same_lane_weights(w1, width).astype(jnp.bfloat16)
    w2m = _make_same_lane_weights(w2, width).astype(jnp.bfloat16)
    # Flipped ConvTranspose kernel in HWIO: wf[kh, kw] = wt[:, :, 3-kh, 2-kw].
    wf = jnp.transpose(wt[:, :, ::-1, ::-1], (2, 3, 0, 1))       # (4, 3, C, C2)
    wu_e0 = _make_up_lane_weight(wf[0, 1], wf[0, 0], wf[0, 2], width)  # even, kh=0
    wu_e1 = _make_up_lane_weight(wf[2, 1], wf[2, 0], wf[2, 2], width)  # even, kh=2
    wu_o0 = _make_up_lane_weight(wf[1, 1], wf[1, 0], wf[1, 2], width)  # odd,  kh=1
    wu_o1 = _make_up_lane_weight(wf[3, 1], wf[3, 0], wf[3, 2], width)  # odd,  kh=3
    # Combined phase weights: out_row[s] = h[s] @ wum[0] + h[s+1] @ wum[1],
    # output lanes = [odd-parity half | even-parity half].
    wum = jnp.stack([jnp.concatenate([wu_o0, wu_e0], axis=1),
                     jnp.concatenate([wu_o1, wu_e1], axis=1)]).astype(jnp.bfloat16)
    b1row = jnp.tile(b1, width).reshape(1, width * c).astype(jnp.float32)
    b2row = jnp.tile(b2, width).reshape(1, width * c).astype(jnp.float32)
    bu = jnp.tile(bt, 2 * width).reshape(1, 2 * width * c2).astype(jnp.float32)
    burow = jnp.concatenate([bu, bu], axis=1)
    return w1m, b1row, w2m, b2row, wum, burow


# ---------------------------------------------------------------------------
# Module forward / params / reference
# ---------------------------------------------------------------------------
def upsample1_forward_nhwc(x_nhwc, prepared):
    """NHWC forward: (N, H, W, 2C) -> (N, 2H+1, 2W, C//2)."""
    w1m, b1row, w2m, b2row, wum, burow = prepared
    n, h, w, cin = x_nhwc.shape
    c2 = cin // 4
    lo = 2 * w * c2
    rows_keep = n * (h + 1)
    m_pad = ((rows_keep + 1 + 7) // 8) * 8          # >= rows_keep+1, 8-aligned

    # Fold the whole batch into one lane-dense row slab.  The single zero row
    # above each image is both that image's top pad and the previous image's
    # bottom pad; extra tail rows (all zero) align M to a multiple of 8.
    x_lane = x_nhwc.reshape(n, h, w * cin)
    slab = jnp.pad(x_lane, ((0, 0), (1, 0), (0, 0))).reshape(1, rows_keep,
                                                             w * cin)
    slab = jnp.pad(slab, ((0, 0), (0, m_pad - rows_keep), (0, 0)))
    row = jnp.arange(m_pad)
    mask = (((row % (h + 1)) != 0) & (row < rows_keep)).astype(jnp.float32)
    mask = mask.reshape(m_pad, 1)

    out = _fused_call(slab, mask, w1m, b1row, w2m, b2row, wum, burow,
                      rows_keep=rows_keep)          # (1, rows_keep, 2*lo)

    # Row r of each image holds [odd_{r-1} | even_r]; a row-major reshape
    # interleaves the parities and dropping the single junk leading row gives
    # the (2H+1)-row transposed-conv output.
    y = out.reshape(n, h + 1, 2, lo).reshape(n, 2 * h + 2, lo)[:, 1:]
    return y.reshape(n, 2 * h + 1, 2 * w, c2)


def upsample1_forward(x_nchw, prepared):
    """Module-exact forward: (N, 2C, H, W) -> (N, C//2, 2H+1, 2W) (NCHW)."""
    x_nhwc = jnp.transpose(x_nchw, (0, 2, 3, 1))
    y = upsample1_forward_nhwc(x_nhwc, prepared)
    return jnp.transpose(y, (0, 3, 1, 2))


def init_params(channels, key):
    """Random parameters in PyTorch-equivalent layouts."""
    c = channels
    ks = jax.random.split(key, 6)
    # conv1: Conv2d(2C, C, 3)  -> HWIO (3, 3, 2C, C)
    w1 = jax.random.uniform(ks[0], (3, 3, 2 * c, c), jnp.float32, -0.05, 0.05)
    b1 = jax.random.uniform(ks[1], (c,), jnp.float32, -0.05, 0.05)
    # conv2: Conv2d(C, C, 3)   -> HWIO (3, 3, C, C)
    w2 = jax.random.uniform(ks[2], (3, 3, c, c), jnp.float32, -0.05, 0.05)
    b2 = jax.random.uniform(ks[3], (c,), jnp.float32, -0.05, 0.05)
    # upconv: ConvTranspose2d(C, C//2, (4, 3))  PyTorch layout (C, C//2, 4, 3)
    wt = jax.random.uniform(ks[4], (c, c // 2, 4, 3), jnp.float32, -0.05, 0.05)
    bt = jax.random.uniform(ks[5], (c // 2,), jnp.float32, -0.05, 0.05)
    return (w1, b1, w2, b2, wt, bt)


def _reference_forward(x_nchw, params):
    """Plain-JAX reference (lax convs) for a correctness check."""
    w1, b1, w2, b2, wt, bt = params
    dn = lax.conv_dimension_numbers(x_nchw.shape, (3, 3, 1, 1),
                                    ("NCHW", "HWIO", "NCHW"))

    def conv(x, w, b, pad):
        y = lax.conv_general_dilated(x, w, (1, 1), pad, dimension_numbers=dn)
        return jnp.maximum(y + b[None, :, None, None], 0.0)

    x = conv(x_nchw, w1, b1, [(1, 1), (1, 1)])
    x = conv(x, w2, b2, [(1, 1), (1, 1)])
    # ConvTranspose2d via lhs_dilation with the spatially flipped kernel.
    wt_eq = jnp.transpose(wt[:, :, ::-1, ::-1], (2, 3, 0, 1))
    y = lax.conv_general_dilated(x, wt_eq, (1, 1), [(2, 3), (1, 2)],
                                 lhs_dilation=(2, 2), dimension_numbers=dn)
    return jnp.maximum(y + bt[None, :, None, None], 0.0)


if __name__ == "__main__":
    channels = 8                      # module's `channels`; input has 2*channels
    N, H, W = 2, 16, 16
    key = jax.random.PRNGKey(0)
    kx, kp = jax.random.split(key)
    x = jax.random.normal(kx, (N, 2 * channels, H, W), jnp.float32)
    params = init_params(channels, kp)
    prepared = prepare_params(params, W)

    fwd = jax.jit(functools.partial(upsample1_forward, prepared=prepared))
    out = jax.block_until_ready(fwd(x))
    assert out.shape == (N, channels // 2, 2 * H + 1, 2 * W), out.shape

    ref = jax.block_until_ready(_reference_forward(x, params))
    assert jnp.allclose(out, ref, atol=5e-2, rtol=5e-2), \
        float(jnp.max(jnp.abs(out - ref)))

    print("KERNEL_OK")
</pallas_src>

<mosaic_0001>
module attributes {stable_mosaic.version = 11 : i64} {
  func.func @_fused_upsample1_kernel(%arg0: i32, %arg1: memref<1x40x256xf32, #tpu.memory_space<vmem>>, %arg2: memref<40x1xf32, #tpu.memory_space<vmem>>, %arg3: memref<3x256x128xbf16, #tpu.memory_space<vmem>>, %arg4: memref<1x128xf32, #tpu.memory_space<vmem>>, %arg5: memref<3x128x128xbf16, #tpu.memory_space<vmem>>, %arg6: memref<1x128xf32, #tpu.memory_space<vmem>>, %arg7: memref<2x128x256xbf16, #tpu.memory_space<vmem>>, %arg8: memref<1x256xf32, #tpu.memory_space<vmem>>, %arg9: memref<1x34x256xf32, #tpu.memory_space<vmem>>) attributes {dimension_semantics = [#tpu.dimension_semantics<parallel>], iteration_bounds = array<i64: 1>, scalar_prefetch = 0 : i64, scratch_operands = 0 : i64, tpu.core_type = #tpu.core_type<tc>, window_params = [{transform_indices = @transform_0, window_bounds = array<i64: 1, 40, 256>}, {pipeline_mode = #tpu.pipeline_mode<synchronous>, transform_indices = @transform_1, window_bounds = array<i64: 40, 1>}, {pipeline_mode = #tpu.pipeline_mode<synchronous>, transform_indices = @transform_2, window_bounds = array<i64: 3, 256, 128>}, {pipeline_mode = #tpu.pipeline_mode<synchronous>, transform_indices = @transform_3, window_bounds = array<i64: 1, 128>}, {pipeline_mode = #tpu.pipeline_mode<synchronous>, transform_indices = @transform_4, window_bounds = array<i64: 3, 128, 128>}, {pipeline_mode = #tpu.pipeline_mode<synchronous>, transform_indices = @transform_5, window_bounds = array<i64: 1, 128>}, {pipeline_mode = #tpu.pipeline_mode<synchronous>, transform_indices = @transform_6, window_bounds = array<i64: 2, 128, 256>}, {pipeline_mode = #tpu.pipeline_mode<synchronous>, transform_indices = @transform_7, window_bounds = array<i64: 1, 256>}, {transform_indices = @transform_8, window_bounds = array<i64: 1, 34, 256>}]} {
    %c0 = arith.constant 0 : index
    %c0_0 = arith.constant 0 : index
    %c0_1 = arith.constant 0 : index
    %0 = vector.load %arg1[%c0, %c0_0, %c0_1] : memref<1x40x256xf32, #tpu.memory_space<vmem>>, vector<1x40x256xf32>
    %1 = vector.shape_cast %0 : vector<1x40x256xf32> to vector<40x256xf32>
    %c0_2 = arith.constant 0 : index
    %c0_3 = arith.constant 0 : index
    %2 = vector.load %arg2[%c0_2, %c0_3] : memref<40x1xf32, #tpu.memory_space<vmem>>, vector<40x1xf32>
    %c1_i32 = arith.constant 1 : i32
    %3 = tpu.dynamic_rotate %1 by %c1_i32 dim 0 : vector<40x256xf32>, i32 -> vector<40x256xf32>
    %c39_i32 = arith.constant 39 : i32
    %4 = tpu.dynamic_rotate %1 by %c39_i32 dim 0 : vector<40x256xf32>, i32 -> vector<40x256xf32>
    %5 = arith.truncf %3 : vector<40x256xf32> to vector<40x256xbf16>
    %c0_4 = arith.constant 0 : index
    %c0_5 = arith.constant 0 : index
    %c0_6 = arith.constant 0 : index
    %6 = vector.load %arg3[%c0_4, %c0_5, %c0_6] : memref<3x256x128xbf16, #tpu.memory_space<vmem>>, vector<1x256x128xbf16>
    %7 = vector.shape_cast %6 : vector<1x256x128xbf16> to vector<256x128xbf16>
    %cst = arith.constant dense<0.000000e+00> : vector<40x128xf32>
    %8 = tpu.matmul %5, %7, %cst {dimension_numbers = #tpu.dot_dimension_numbers<[1], [0], [0], [1], [0, 0, 1, 1], [], []>} : vector<40x256xbf16>, vector<256x128xbf16>, vector<40x128xf32> -> vector<40x128xf32>
    %9 = arith.truncf %1 : vector<40x256xf32> to vector<40x256xbf16>
    %c1 = arith.constant 1 : index
    %c0_7 = arith.constant 0 : index
    %c0_8 = arith.constant 0 : index
    %10 = vector.load %arg3[%c1, %c0_7, %c0_8] : memref<3x256x128xbf16, #tpu.memory_space<vmem>>, vector<1x256x128xbf16>
    %11 = vector.shape_cast %10 : vector<1x256x128xbf16> to vector<256x128xbf16>
    %cst_9 = arith.constant dense<0.000000e+00> : vector<40x128xf32>
    %12 = tpu.matmul %9, %11, %cst_9 {dimension_numbers = #tpu.dot_dimension_numbers<[1], [0], [0], [1], [0, 0, 1, 1], [], []>} : vector<40x256xbf16>, vector<256x128xbf16>, vector<40x128xf32> -> vector<40x128xf32>
    %13 = arith.addf %8, %12 : vector<40x128xf32>
    %14 = arith.truncf %4 : vector<40x256xf32> to vector<40x256xbf16>
    %c2 = arith.constant 2 : index
    %c0_10 = arith.constant 0 : index
    %c0_11 = arith.constant 0 : index
    %15 = vector.load %arg3[%c2, %c0_10, %c0_11] : memref<3x256x128xbf16, #tpu.memory_space<vmem>>, vector<1x256x128xbf16>
    %16 = vector.shape_cast %15 : vector<1x256x128xbf16> to vector<256x128xbf16>
    %cst_12 = arith.constant dense<0.000000e+00> : vector<40x128xf32>
    %17 = tpu.matmul %14, %16, %cst_12 {dimension_numbers = #tpu.dot_dimension_numbers<[1], [0], [0], [1], [0, 0, 1, 1], [], []>} : vector<40x256xbf16>, vector<256x128xbf16>, vector<40x128xf32> -> vector<40x128xf32>
    %18 = arith.addf %13, %17 : vector<40x128xf32>
    %c0_13 = arith.constant 0 : index
    %c0_14 = arith.constant 0 : index
    %19 = vector.load %arg4[%c0_13, %c0_14] : memref<1x128xf32, #tpu.memory_space<vmem>>, vector<1x128xf32>
    %20 = vector.broadcast %19 : vector<1x128xf32> to vector<40x128xf32>
    %21 = arith.addf %18, %20 : vector<40x128xf32>
    %cst_15 = arith.constant 0.000000e+00 : f32
    %22 = vector.broadcast %cst_15 : f32 to vector<40x128xf32>
    %23 = arith.maximumf %21, %22 : vector<40x128xf32>
    %24 = vector.broadcast %2 : vector<40x1xf32> to vector<40x128xf32>
    %25 = arith.mulf %23, %24 : vector<40x128xf32>
    %c1_i32_16 = arith.constant 1 : i32
    %26 = tpu.dynamic_rotate %25 by %c1_i32_16 dim 0 : vector<40x128xf32>, i32 -> vector<40x128xf32>
    %c39_i32_17 = arith.constant 39 : i32
    %27 = tpu.dynamic_rotate %25 by %c39_i32_17 dim 0 : vector<40x128xf32>, i32 -> vector<40x128xf32>
    %28 = arith.truncf %26 : vector<40x128xf32> to vector<40x128xbf16>
    %c0_18 = arith.constant 0 : index
    %c0_19 = arith.constant 0 : index
    %c0_20 = arith.constant 0 : index
    %29 = vector.load %arg5[%c0_18, %c0_19, %c0_20] : memref<3x128x128xbf16, #tpu.memory_space<vmem>>, vector<1x128x128xbf16>
    %30 = vector.shape_cast %29 : vector<1x128x128xbf16> to vector<128x128xbf16>
    %cst_21 = arith.constant dense<0.000000e+00> : vector<40x128xf32>
    %31 = tpu.matmul %28, %30, %cst_21 {dimension_numbers = #tpu.dot_dimension_numbers<[1], [0], [0], [1], [0, 0, 1, 1], [], []>} : vector<40x128xbf16>, vector<128x128xbf16>, vector<40x128xf32> -> vector<40x128xf32>
    %32 = arith.truncf %25 : vector<40x128xf32> to vector<40x128xbf16>
    %c1_22 = arith.constant 1 : index
    %c0_23 = arith.constant 0 : index
    %c0_24 = arith.constant 0 : index
    %33 = vector.load %arg5[%c1_22, %c0_23, %c0_24] : memref<3x128x128xbf16, #tpu.memory_space<vmem>>, vector<1x128x128xbf16>
    %34 = vector.shape_cast %33 : vector<1x128x128xbf16> to vector<128x128xbf16>
    %cst_25 = arith.constant dense<0.000000e+00> : vector<40x128xf32>
    %35 = tpu.matmul %32, %34, %cst_25 {dimension_numbers = #tpu.dot_dimension_numbers<[1], [0], [0], [1], [0, 0, 1, 1], [], []>} : vector<40x128xbf16>, vector<128x128xbf16>, vector<40x128xf32> -> vector<40x128xf32>
    %36 = arith.addf %31, %35 : vector<40x128xf32>
    %37 = arith.truncf %27 : vector<40x128xf32> to vector<40x128xbf16>
    %c2_26 = arith.constant 2 : index
    %c0_27 = arith.constant 0 : index
    %c0_28 = arith.constant 0 : index
    %38 = vector.load %arg5[%c2_26, %c0_27, %c0_28] : memref<3x128x128xbf16, #tpu.memory_space<vmem>>, vector<1x128x128xbf16>
    %39 = vector.shape_cast %38 : vector<1x128x128xbf16> to vector<128x128xbf16>
    %cst_29 = arith.constant dense<0.000000e+00> : vector<40x128xf32>
    %40 = tpu.matmul %37, %39, %cst_29 {dimension_numbers = #tpu.dot_dimension_numbers<[1], [0], [0], [1], [0, 0, 1, 1], [], []>} : vector<40x128xbf16>, vector<128x128xbf16>, vector<40x128xf32> -> vector<40x128xf32>
    %41 = arith.addf %36, %40 : vector<40x128xf32>
    %c0_30 = arith.constant 0 : index
    %c0_31 = arith.constant 0 : index
    %42 = vector.load %arg6[%c0_30, %c0_31] : memref<1x128xf32, #tpu.memory_space<vmem>>, vector<1x128xf32>
    %43 = vector.broadcast %42 : vector<1x128xf32> to vector<40x128xf32>
    %44 = arith.addf %41, %43 : vector<40x128xf32>
    %cst_32 = arith.constant 0.000000e+00 : f32
    %45 = vector.broadcast %cst_32 : f32 to vector<40x128xf32>
    %46 = arith.maximumf %44, %45 : vector<40x128xf32>
    %47 = vector.broadcast %2 : vector<40x1xf32> to vector<40x128xf32>
    %48 = arith.mulf %46, %47 : vector<40x128xf32>
    %c39_i32_33 = arith.constant 39 : i32
    %49 = tpu.dynamic_rotate %48 by %c39_i32_33 dim 0 : vector<40x128xf32>, i32 -> vector<40x128xf32>
    %50 = arith.truncf %48 : vector<40x128xf32> to vector<40x128xbf16>
    %c0_34 = arith.constant 0 : index
    %c0_35 = arith.constant 0 : index
    %c0_36 = arith.constant 0 : index
    %51 = vector.load %arg7[%c0_34, %c0_35, %c0_36] : memref<2x128x256xbf16, #tpu.memory_space<vmem>>, vector<1x128x256xbf16>
    %52 = vector.shape_cast %51 : vector<1x128x256xbf16> to vector<128x256xbf16>
    %cst_37 = arith.constant dense<0.000000e+00> : vector<40x256xf32>
    %53 = tpu.matmul %50, %52, %cst_37 {dimension_numbers = #tpu.dot_dimension_numbers<[1], [0], [0], [1], [0, 0, 1, 1], [], []>} : vector<40x128xbf16>, vector<128x256xbf16>, vector<40x256xf32> -> vector<40x256xf32>
    %54 = arith.truncf %49 : vector<40x128xf32> to vector<40x128xbf16>
    %c1_38 = arith.constant 1 : index
    %c0_39 = arith.constant 0 : index
    %c0_40 = arith.constant 0 : index
    %55 = vector.load %arg7[%c1_38, %c0_39, %c0_40] : memref<2x128x256xbf16, #tpu.memory_space<vmem>>, vector<1x128x256xbf16>
    %56 = vector.shape_cast %55 : vector<1x128x256xbf16> to vector<128x256xbf16>
    %cst_41 = arith.constant dense<0.000000e+00> : vector<40x256xf32>
    %57 = tpu.matmul %54, %56, %cst_41 {dimension_numbers = #tpu.dot_dimension_numbers<[1], [0], [0], [1], [0, 0, 1, 1], [], []>} : vector<40x128xbf16>, vector<128x256xbf16>, vector<40x256xf32> -> vector<40x256xf32>
    %58 = arith.addf %53, %57 : vector<40x256xf32>
    %c0_42 = arith.constant 0 : index
    %c0_43 = arith.constant 0 : index
    %59 = vector.load %arg8[%c0_42, %c0_43] : memref<1x256xf32, #tpu.memory_space<vmem>>, vector<1x256xf32>
    %60 = vector.broadcast %59 : vector<1x256xf32> to vector<40x256xf32>
    %61 = arith.addf %58, %60 : vector<40x256xf32>
    %cst_44 = arith.constant 0.000000e+00 : f32
    %62 = vector.broadcast %cst_44 : f32 to vector<40x256xf32>
    %63 = arith.maximumf %61, %62 : vector<40x256xf32>
    %64 = vector.extract_strided_slice %63 {offsets = [0, 0], sizes = [34, 256], strides = [1, 1]} : vector<40x256xf32> to vector<34x256xf32>
    %c0_45 = arith.constant 0 : index
    %c0_46 = arith.constant 0 : index
    %c0_47 = arith.constant 0 : index
    %65 = vector.load %arg9[%c0_45, %c0_46, %c0_47] : memref<1x34x256xf32, #tpu.memory_space<vmem>>, vector<1x34x256xf32>
    %66 = vector.shape_cast %65 : vector<1x34x256xf32> to vector<34x256xf32>
    %67 = vector.shape_cast %64 : vector<34x256xf32> to vector<1x34x256xf32>
    tpu.vector_store %arg9[%c0_45, %c0_46, %c0_47], %67 {strides = array<i32>} : memref<1x34x256xf32, #tpu.memory_space<vmem>>, vector<1x34x256xf32>,
    return
  }
  func.func @transform_0(%arg0: i32) -> (i32, i32, i32) {
    %c0_i32 = arith.constant 0 : i32
    %c0_i32_0 = arith.constant 0 : i32
    %c0_i32_1 = arith.constant 0 : i32
    return %arg0, %c0_i32, %c0_i32_0 : i32, i32, i32
  }
  func.func @transform_1(%arg0: i32) -> (i32, i32) {
    %c0_i32 = arith.constant 0 : i32
    %c0_i32_0 = arith.constant 0 : i32
    %c0_i32_1 = arith.constant 0 : i32
    return %c0_i32, %c0_i32_0 : i32, i32
  }
  func.func @transform_2(%arg0: i32) -> (i32, i32, i32) {
    %c0_i32 = arith.constant 0 : i32
    %c0_i32_0 = arith.constant 0 : i32
    %c0_i32_1 = arith.constant 0 : i32
    %c0_i32_2 = arith.constant 0 : i32
    return %c0_i32, %c0_i32_0, %c0_i32_1 : i32, i32, i32
  }
  func.func @transform_3(%arg0: i32) -> (i32, i32) {
    %c0_i32 = arith.constant 0 : i32
    %c0_i32_0 = arith.constant 0 : i32
    %c0_i32_1 = arith.constant 0 : i32
    return %c0_i32, %c0_i32_0 : i32, i32
  }
  func.func @transform_4(%arg0: i32) -> (i32, i32, i32) {
    %c0_i32 = arith.constant 0 : i32
    %c0_i32_0 = arith.constant 0 : i32
    %c0_i32_1 = arith.constant 0 : i32
    %c0_i32_2 = arith.constant 0 : i32
    return %c0_i32, %c0_i32_0, %c0_i32_1 : i32, i32, i32
  }
  func.func @transform_5(%arg0: i32) -> (i32, i32) {
    %c0_i32 = arith.constant 0 : i32
    %c0_i32_0 = arith.constant 0 : i32
    %c0_i32_1 = arith.constant 0 : i32
    return %c0_i32, %c0_i32_0 : i32, i32
  }
  func.func @transform_6(%arg0: i32) -> (i32, i32, i32) {
    %c0_i32 = arith.constant 0 : i32
    %c0_i32_0 = arith.constant 0 : i32
    %c0_i32_1 = arith.constant 0 : i32
    %c0_i32_2 = arith.constant 0 : i32
    return %c0_i32, %c0_i32_0, %c0_i32_1 : i32, i32, i32
  }
  func.func @transform_7(%arg0: i32) -> (i32, i32) {
    %c0_i32 = arith.constant 0 : i32
    %c0_i32_0 = arith.constant 0 : i32
    %c0_i32_1 = arith.constant 0 : i32
    return %c0_i32, %c0_i32_0 : i32, i32
  }
  func.func @transform_8(%arg0: i32) -> (i32, i32, i32) {
    %c0_i32 = arith.constant 0 : i32
    %c0_i32_0 = arith.constant 0 : i32
    %c0_i32_1 = arith.constant 0 : i32
    return %arg0, %c0_i32, %c0_i32_0 : i32, i32, i32
  }
}

</mosaic_0001>

<bundles_post_ra>
// kernel: upsample1_forward.1
= control target key start
LH: loop header
LB: loop body
LE: loop exit
PB: predicated region body
PF: predicated region fallthrough
CT: control target
= control target key end

     0   :  { %v2078_v1 = vmov 0   ;;  %v55_v21 = vlaneseq  ;;  %vm2080_vm2 = vmmov 0   ;;  %s2762_s2 = inlined_call_operand.vmem [shape: bf16[3,256,128], index: 2, kind: input, shape index: {}]   ;;  %s2763_s0 = inlined_call_operand.vmem [shape: f32[1,40,256], index: 0, kind: input, shape index: {}]   ;;  %s2764_s1 = inlined_call_operand.vmem [shape: f32[40,1], index: 1, kind: input, shape index: {}]   ;;  %s2765_s4 = inlined_call_operand.vmem [shape: bf16[3,128,128], index: 4, kind: input, shape index: {}]   ;;  %s2766_s3 = inlined_call_operand.vmem [shape: f32[1,128], index: 3, kind: input, shape index: {}]   ;;  %s2767_s6 = inlined_call_operand.vmem [shape: bf16[2,128,256], index: 6, kind: input, shape index: {}]   ;;  %s2768_s5 = inlined_call_operand.vmem [shape: f32[1,128], index: 5, kind: input, shape index: {}]   ;;  %s2769_s7 = inlined_call_operand.vmem [shape: f32[1,256], index: 7, kind: input, shape index: {}]   ;;  %s2770_s8 = inlined_call_operand.vmem [shape: f32[1,34,256], index: 8, kind: output, shape index: {}]  }
   0x1   :  { %v1958_v0 = vld [vmem:[%s2762_s2 + $0xc0] sm:$0xff]   ;;  %1956 = vset.pattern.permute.xlu0 %v2078_v1  ;;  %1957 = vset.pattern.permute.xlu1 %v2078_v1  ;;  %v1960_v3 = vld [vmem:[%s2762_s2 + $0xc8] sm:$0xff]   ;;  %v1962_v5 = vld [vmem:[%s2762_s2 + $0xd0] sm:$0xff]  }
   0x2   :  { %v1959_v2 = vld [vmem:[%s2762_s2 + $0x80] sm:$0xff]   ;;  %1726 = vmatprep.subr.bf16.mxu1 %v1958_v0  ;;  %v1961_v4 = vld [vmem:[%s2762_s2 + $0x88] sm:$0xff]   ;;  %v1963_v6 = vld [vmem:[%s2762_s2 + $0x90] sm:$0xff]   ;;  %v2213_v28 = vshrl.u32 %v55_v21, 7 }
   0x3   :  { %1727 = vmatpush3.bf16.msra.mxu1 %v1959_v2  ;;  %v1964_v7 = vld [vmem:[%s2762_s2 + $0xd8] sm:$0xff]   ;;  %v1966_v9 = vld [vmem:[%s2762_s2 + $0xe0] sm:$0xff]   ;;  %v1968_v11 = vld [vmem:[%s2762_s2 + $0xe8] sm:$0xff]  }
   0x4   :  { %1728 = vmatprep.subr.bf16.mxu1 %v1960_v3  ;;  %v1965_v8 = vld [vmem:[%s2762_s2 + $0x98] sm:$0xff]   ;;  %v1967_v10 = vld [vmem:[%s2762_s2 + $0xa0] sm:$0xff]   ;;  %v2164_v12 = vld [vmem:[%s2763_s0 + $0x8] sm:$0xff]  ;;  %vm78_vm0 = vcmp.lt.s32.totalorder %v2213_v28, 7  ;;  %vm57_vm1 = vcmp.lt.s32.totalorder %v2213_v28, 1 }
   0x5   :  { %v2169_v13 = vld [vmem:[%s2763_s0 + $0x18] sm:$0xff]  ;;  %v1974_v15 = vld [vmem:[%s2762_s2 + $0x140] sm:$0xff]   ;;  %v1969_v16 = vld [vmem:[%s2762_s2 + $0xa8] sm:$0xff]   ;;  %v69_v30 = vrot.slane %v2164_v12, 1  ;;  %v46_v52 = vrot.slane %v2164_v12, 7 }
   0x6   :  { %v128_v14 = vpack.c.bf16 %v2169_v13, %v2164_v12  ;;  %v1970_v17 = vld [vmem:[%s2762_s2 + $0xf0] sm:$0xff]   ;;  %1794 = vmatprep.subr.bf16.mxu0 %v1974_v15  ;;  %v1976_v18 = vld [vmem:[%s2762_s2 + $0x100] sm:$0xff]   ;;  %v1978_v20 = vld [vmem:[%s2762_s2 + $0x148] sm:$0xff]   ;;  %v71_v33 = vrot.slane %v2169_v13, 1  ;;  %v48_v54 = vrot.slane %v2169_v13, 7 }
   0x7   :  { %1729 = vmatpush3.bf16.msra.mxu1 %v1961_v4  ;;  %v1971_v19 = vld [vmem:[%s2762_s2 + $0xb0] sm:$0xff]   ;;  %1795 = vmatpush3.bf16.msra.mxu0 %v1976_v18  ;;  %v1972_v22 = vld [vmem:[%s2762_s2 + $0xf8] sm:$0xff]   ;;  %v2200_v24 = vld [vmem:[%s2763_s0] sm:$0xff] }
   0x8   :  { %1730 = vmatprep.subr.bf16.mxu1 %v1962_v5  ;;  %294 = vmatprep.mubr.bf16.mxu1 %v128_v14  ;;  %v1973_v23 = vld [vmem:[%s2762_s2 + $0xb8] sm:$0xff]   ;;  %v1980_v25 = vld [vmem:[%s2762_s2 + $0x108] sm:$0xff]   ;;  %v2208_v26 = vld [vmem:[%s2763_s0 + $0x10] sm:$0xff]  ;;  %v86_v43 = vsel %vm78_vm0, %v69_v30, %v71_v33  ;;  %v68_v62 = vrot.slane %v2200_v24, 1  ;;  %v65_v3 = vsel %vm57_vm1, %v46_v52, %v48_v54 }
   0x9   :  { %1796 = vmatprep.subr.bf16.mxu0 %v1978_v20  ;;  %v1982_v27 = vld [vmem:[%s2762_s2 + $0x150] sm:$0xff]   ;;  %v1975_v29 = vld [vmem:[%s2762_s2 + $0x40] sm:$0xff]   ;;  %v127_v34 = vpack.c.bf16 %v2208_v26, %v2200_v24  ;;  %v1979_v35 = vld [vmem:[%s2762_s2 + $0x48] sm:$0xff]   ;;  %v70_v63 = vrot.slane %v2208_v26, 1 }
   0xa   :  { %v1977_v31 = vld [vmem:[%s2762_s2] sm:$0xff]   ;;  %v1984_v32 = vld [vmem:[%s2762_s2 + $0x110] sm:$0xff]   ;;  %v1986_v36 = vld [vmem:[%s2762_s2 + $0x158] sm:$0xff]  }
   0xb   :  { %1731 = vmatpush3.bf16.msra.mxu1 %v1963_v6  ;;  %1797 = vmatpush3.bf16.msra.mxu0 %v1980_v25  ;;  %v2237_v37 = vld [vmem:[%s2763_s0 + $0x28] sm:$0xff]  ;;  %v2243_v38 = vld [vmem:[%s2763_s0 + $0x38] sm:$0xff]  ;;  %v2261_v44 = vld [vmem:[%s2763_s0 + $0x20] sm:$0xff] }
   0xc   :  { %1732 = vmatprep.subr.bf16.mxu1 %v1964_v7  ;;  %1798 = vmatprep.subr.bf16.mxu0 %v1982_v27  ;;  %v130_v39 = vpack.c.bf16 %v2243_v38, %v2237_v37  ;;  %v1988_v40 = vld [vmem:[%s2762_s2 + $0x118] sm:$0xff]   ;;  %v1981_v41 = vld [vmem:[%s2762_s2 + $0x8] sm:$0xff]   ;;  %v73_v42 = vrot.slane %v2237_v37, 1  ;;  %v2266_v45 = vld [vmem:[%s2763_s0 + $0x30] sm:$0xff]  ;;  %v75_v5 = vrot.slane %v2243_v38, 1  ;;  %v72_v6 = vrot.slane %v2261_v44, 1 }
   0xd   :  { %v1983_v46 = vld [vmem:[%s2762_s2 + $0x50] sm:$0xff]   ;;  %v1990_v48 = vld [vmem:[%s2762_s2 + $0x160] sm:$0xff]   ;;  %v129_v51 = vpack.c.bf16 %v2266_v45, %v2261_v44  ;;  %v1987_v55 = vld [vmem:[%s2762_s2 + $0x58] sm:$0xff]  }
   0xe   :  { %v84_v47 = vsel %vm78_vm0, %v71_v33, %v73_v42  ;;  %v1985_v50 = vld [vmem:[%s2762_s2 + $0x10] sm:$0xff]   ;;  %v1992_v53 = vld [vmem:[%s2762_s2 + $0x120] sm:$0xff]   ;;  %v1994_v56 = vld [vmem:[%s2762_s2 + $0x168] sm:$0xff]   ;;  %v83_v18 = vsel %vm78_vm0, %v70_v63, %v72_v6 }
   0xf   :  { %1733 = vmatpush3.bf16.msra.mxu1 %v1965_v8  ;;  %1799 = vmatpush3.bf16.msra.mxu0 %v1984_v32  ;;  %v471_v49 = vpack.c.bf16 %v84_v47, %v86_v43  ;;  %v2297_v57 = vld [vmem:[%s2763_s0 + $0x48] sm:$0xff]  ;;  %v1989_v58 = vld [vmem:[%s2762_s2 + $0x18] sm:$0xff]   ;;  %v1991_v61 = vld [vmem:[%s2762_s2 + $0x60] sm:$0xff]  }
  0x10   :  { %1734 = vmatprep.subr.bf16.mxu1 %v1966_v9  ;;  %1800 = vmatprep.subr.bf16.mxu0 %v1986_v36  ;;  %v54_v59 = vrot.slane %v2297_v57, 7  ;;  %v132_v60 = vpack.c.bf16 %v2297_v57, %v2297_v57  ;;  %v1996_v0 = vld [vmem:[%s2762_s2 + $0x128] sm:$0xff]   ;;  %v2317_v2 = vld [vmem:[%s2763_s0 + $0x40] sm:$0xff]  ;;  %v1998_v8 = vld [vmem:[%s2762_s2 + $0x170] sm:$0xff]  }
  0x11   :  { %637 = vmatprep.mubr.bf16.mxu0 %v471_v49  ;;  %v1993_v7 = vld [vmem:[%s2762_s2 + $0x20] sm:$0xff]   ;;  %v131_v9 = vpack.c.bf16 %v2317_v2, %v2317_v2  ;;  %v2000_v15 = vld [vmem:[%s2762_s2 + $0x130] sm:$0xff]   ;;  %v53_v36 = vrot.slane %v2317_v2, 7  ;;  %v43_v43 = vld [vmem:[%s2764_s1 + $0x18] sm:$0xff] }
  0x12   :  { %v67_v4 = vsel %vm57_vm1, %v54_v59, %v46_v52  ;;  %v1999_v20 = vld [vmem:[%s2762_s2 + $0x70] sm:$0xff]   ;;  %v40_v27 = vld [vmem:[%s2764_s1] sm:$0xff] }
  0x13   :  { %1735 = vmatpush3.bf16.msra.mxu1 %v1967_v10  ;;  %1801 = vmatpush3.bf16.msra.mxu0 %v1988_v40  ;;  %v77_v10 = vrot.slane %v2297_v57, 1  ;;  %v90_v14 = vpack.c.bf16 %v65_v3, %v67_v4  ;;  %v42_v33 = vld [vmem:[%s2764_s1 + $0x10] sm:$0xff]  ;;  %v41_v40 = vld [vmem:[%s2764_s1 + $0x8] sm:$0xff]  ;;  %v2006_v57 = vld [vmem:[%s2765_s4 + $0x40] sm:$0xff]  }
  0x14   :  { %1736 = vmatprep.subr.bf16.mxu1 %v1968_v11  ;;  %1802 = vmatprep.subr.bf16.mxu0 %v1990_v48  ;;  %v1995_v11 = vld [vmem:[%s2762_s2 + $0x68] sm:$0xff]   ;;  %v2009_v3 = vld [vmem:[%s2765_s4 + $0x58] sm:$0xff]   ;;  %v2010_v4 = vld [vmem:[%s2765_s4 + $0x60] sm:$0xff]  }
  0x15   :  { %v80_v21 = vsel %vm78_vm0, %v75_v5, %v77_v10  ;;  %685 = vperm.xlu0 %1956, %v40_v27   ;;  %695 = vperm.xlu1 %1957, %v42_v33   ;;  %v88_v49 = vsel %vm78_vm0, %v77_v10, %v69_v30  ;;  %v49_v30 = vrot.slane %v2261_v44, 7  ;;  %v2016_v10 = vld [vmem:[%s2765_s4 + $0x78] sm:$0xff]  }
  0x16   :  { %v475_v12 = vpack.c.bf16 %v88_v49, %v88_v49 }
  0x17   :  { %1737 = vmatpush3.bf16.msra.mxu1 %v1969_v16  ;;  %1803 = vmatpush3.bf16.msra.mxu0 %v1992_v53  ;;  %v1997_v16 = vld [vmem:[%s2762_s2 + $0x28] sm:$0xff]  }
  0x18   :  { %1738 = vmatprep.subr.bf16.mxu1 %v1970_v17  ;;  %1804 = vmatprep.subr.bf16.mxu0 %v1994_v56  ;;  %v2002_v17 = vld [vmem:[%s2762_s2 + $0x178] sm:$0xff]   ;;  %v51_v56 = vrot.slane %v2266_v45, 7 }
  0x19   :  { %690 = vperm.xlu0 %1956, %v41_v40   ;;  %700 = vperm.xlu1 %1957, %v43_v43  }
  0x1b   :  { %1739 = vmatpush3.bf16.msra.mxu1 %v1971_v19  ;;  %1805 = vmatpush3.bf16.msra.mxu0 %v1996_v0  ;;  %v85_v19 = vsel %vm78_vm0, %v68_v62, %v70_v63  ;;  %v2079_v0 = vmov 0.0  }
  0x1c   :  { %1740 = vmatprep.subr.bf16.mxu1 %v1972_v22  ;;  %1806 = vmatprep.subr.bf16.mxu0 %v1998_v8  ;;  %v82_v22 = vsel %vm78_vm0, %v73_v42, %v75_v5  ;;  %v470_v25 = vpack.c.bf16 %v83_v18, %v85_v19  ;;  %v52_v42 = vrot.slane %v2243_v38, 7  ;;  %v2011_v5 = vld [vmem:[%s2765_s4] sm:$0xff]   ;;  %v2014_v8 = vld [vmem:[%s2765_s4 + $0x70] sm:$0xff]  }
  0x1d   :  { %v473_v32 = vpack.c.bf16 %v80_v21, %v82_v22 }
  0x1e   :  { %v59_v44 = vsel %vm57_vm1, %v52_v42, %v54_v59  ;;  %v2007_v59 = vld [vmem:[%s2765_s4 + $0x48] sm:$0xff]  }
  0x1f   :  { %1741 = vmatpush3.bf16.msra.mxu1 %v1973_v23  ;;  %1807 = vmatpush3.bf16.msra.mxu0 %v2000_v15  ;;  %v2004_v23 = vld [vmem:[%s2762_s2 + $0x138] sm:$0xff]   ;;  %v94_v63 = vpack.c.bf16 %v59_v44, %v59_v44  ;;  %v2021_v15 = vld [vmem:[%s2765_s4 + $0x28] sm:$0xff]  }
  0x20   :  { %1760 = vmatprep.subr.bf16.mxu1 %v1975_v29  ;;  %1808 = vmatprep.subr.bf16.mxu0 %v2002_v17  ;;  %v74_v29 = vrot.slane %v2266_v45, 1  ;;  %v2025_v17 = vld [vmem:[%s2765_s4 + $0x38] sm:$0xff]  }
  0x22   :  { %295 = vmatmul.mubr.bf16.vlgmr.msra.gmra.mrb[0].mxu1 %v127_v34  ;;  %v45_v34 = vrot.slane %v2200_v24, 7  ;;  %v81_v47 = vsel %vm78_vm0, %v72_v6, %v74_v29  ;;  %v58_v24 = vsel %vm57_vm1, %v51_v56, %v53_v36  ;;  %v2012_v6 = vld [vmem:[%s2765_s4 + $0x68] sm:$0xff]  }
  0x23   :  { %1761 = vmatpush3.bf16.msra.mxu1 %v1977_v31  ;;  %302 = vmatprep.mubr.bf16.mxu1 %v130_v39  ;;  %v76_v31 = vrot.slane %v2317_v2, 1  ;;  %v2001_v39 = vld [vmem:[%s2762_s2 + $0x30] sm:$0xff]  }
  0x24   :  { %1762 = vmatprep.subr.bf16.mxu1 %v1979_v35  ;;  %1809 = vmatpush3.bf16.msra.mxu0 %v2004_v23  ;;  %v47_v35 = vrot.slane %v2208_v26, 7  ;;  %v2003_v26 = vld [vmem:[%s2762_s2 + $0x78] sm:$0xff]   ;;  %v66_v48 = vsel %vm57_vm1, %v53_v36, %v45_v34  ;;  %v2008_v2 = vld [vmem:[%s2765_s4 + $0x50] sm:$0xff]  }
  0x25   :  { %v87_v13 = vsel %vm78_vm0, %v76_v31, %v68_v62  ;;  %v93_v62 = vpack.c.bf16 %v58_v24, %v58_v24  ;;  %1889 = vmatprep.subr.bf16.mxu0 %v2079_v0 }
  0x26   :  { %v64_v38 = vsel %vm57_vm1, %v45_v34, %v47_v35  ;;  %v474_v45 = vpack.c.bf16 %v87_v13, %v87_v13  ;;  %v1620_v13 = vld [vmem:[%s2766_s3] ss:$0 sm:$0xff] }
  0x27   :  { %1763 = vmatpush3.bf16.msra.mxu1 %v1981_v41  ;;  %v50_v41 = vrot.slane %v2237_v37, 7  ;;  %638 = vmatmul.mubr.bf16.vlgmr.msra.gmra.mrb[0].mxu0 %v470_v25  ;;  %v2005_v37 = vld [vmem:[%s2762_s2 + $0x38] sm:$0xff]  }
  0x28   :  { %1764 = vmatprep.subr.bf16.mxu1 %v1983_v46  ;;  %645 = vmatprep.mubr.bf16.mxu0 %v473_v32  ;;  %v79_v46 = vsel %vm78_vm0, %v74_v29, %v76_v31 }
  0x29   :  { %v63_v52 = vsel %vm57_vm1, %v48_v54, %v50_v41  ;;  %v472_v53 = vpack.c.bf16 %v79_v46, %v81_v47  ;;  %v60_v54 = vsel %vm57_vm1, %v49_v30, %v51_v56  ;;  %1890 = vmatpush3.bf16.msra.mxu0 %v2011_v5 }
  0x2a   :  { %303 = vmatmul.mubr.bf16.gmra.mrb[4].mxu1 %v129_v51  ;;  %v61_v51 = vsel %vm57_vm1, %v50_v41, %v52_v42  ;;  %1891 = vmatprep.subr.bf16.mxu0 %v2079_v0 }
  0x2b   :  { %1765 = vmatpush3.bf16.msra.mxu1 %v1985_v50  ;;  %310 = vmatprep.mubr.bf16.mxu1 %v132_v60  ;;  %v44_v50 = vld [vmem:[%s2764_s1 + $0x20] sm:$0xff]  ;;  %v62_v60 = vsel %vm57_vm1, %v47_v35, %v49_v30 }
  0x2c   :  { %1766 = vmatprep.subr.bf16.mxu1 %v1987_v55  ;;  %v89_v55 = vpack.c.bf16 %v64_v38, %v66_v48  ;;  %705 = vperm.xlu0 %1956, %v44_v50  }
  0x2f   :  { %1767 = vmatpush3.bf16.msra.mxu1 %v1989_v58  ;;  %v92_v58 = vpack.c.bf16 %v61_v51, %v63_v52  ;;  %646 = vmatmul.mubr.bf16.gmra.mrb[4].mxu0 %v472_v53 }
  0x30   :  { %1768 = vmatprep.subr.bf16.mxu1 %v1991_v61  ;;  %653 = vmatprep.mubr.bf16.mxu0 %v475_v12  ;;  %v91_v61 = vpack.c.bf16 %v60_v54, %v62_v60 }
  0x32   :  { %311 = vmatmul.mubr.bf16.gmra.mrb[8].mxu1 %v131_v9  ;;  %v2015_v9 = vld [vmem:[%s2765_s4 + $0x10] sm:$0xff]  }
  0x33   :  { %1769 = vmatpush3.bf16.msra.mxu1 %v1993_v7  ;;  %446 = vmatprep.mubr.bf16.mxu1 %v90_v14  ;;  %v2013_v7 = vld [vmem:[%s2765_s4 + $0x8] sm:$0xff]   ;;  %v2019_v14 = vld [vmem:[%s2765_s4 + $0x20] sm:$0xff]  }
  0x34   :  { %1770 = vmatprep.subr.bf16.mxu1 %v1995_v11  ;;  %1892 = vmatpush3.bf16.msra.mxu0 %v2013_v7  ;;  %v2017_v11 = vld [vmem:[%s2765_s4 + $0x18] sm:$0xff]  }
  0x35   :  { %1893 = vmatprep.subr.bf16.mxu0 %v2079_v0 }
  0x37   :  { %1771 = vmatpush3.bf16.msra.mxu1 %v1997_v16  ;;  %654 = vmatmul.mubr.bf16.gmra.mrb[8].mxu0 %v474_v45  ;;  %v2023_v16 = vld [vmem:[%s2765_s4 + $0x30] sm:$0xff]  }
  0x38   :  { %1772 = vmatprep.subr.bf16.mxu1 %v1999_v20  ;;  %1894 = vmatpush3.bf16.msra.mxu0 %v2015_v9 }
  0x39   :  { %1895 = vmatprep.subr.bf16.mxu0 %v2079_v0  ;;  %1905 = vmatprep.mubr.msk.bf16.mxu0 %vm2080_vm2, %v2079_v0 }
  0x3b   :  { %1773 = vmatpush3.bf16.msra.mxu1 %v2001_v39 }
  0x3c   :  { %1774 = vmatprep.subr.bf16.mxu1 %v2003_v26  ;;  %1896 = vmatpush3.bf16.msra.mxu0 %v2017_v11 }
  0x3d   :  { %1897 = vmatprep.subr.bf16.mxu0 %v2079_v0 }
  0x3f   :  { %1775 = vmatpush3.bf16.msra.mxu1 %v2005_v37 }
  0x40   :  { %1861 = vmatprep.subr.bf16.mxu1 %v2079_v0  ;;  %1898 = vmatpush3.bf16.msra.mxu0 %v2019_v14 }
  0x41   :  { %1899 = vmatprep.subr.bf16.mxu0 %v2079_v0 }
  0x42   :  { %447 = vmatmul.mubr.bf16.vlgmr.msra.gmra.mrb[12].mxu1 %v89_v55 }
  0x43   :  { %454 = vmatprep.mubr.bf16.mxu1 %v92_v58  ;;  %1862 = vmatpush3.bf16.msra.mxu1 %v2006_v57 }
  0x44   :  { %1863 = vmatprep.subr.bf16.mxu1 %v2079_v0  ;;  %1900 = vmatpush3.bf16.msra.mxu0 %v2021_v15 }
  0x45   :  { %1901 = vmatprep.subr.bf16.mxu0 %v2079_v0 }
  0x47   :  { %1864 = vmatpush3.bf16.msra.mxu1 %v2007_v59 }
  0x48   :  { %1865 = vmatprep.subr.bf16.mxu1 %v2079_v0  ;;  %1902 = vmatpush3.bf16.msra.mxu0 %v2023_v16 }
  0x49   :  { %1903 = vmatprep.subr.bf16.mxu0 %v2079_v0 }
  0x4a   :  { %455 = vmatmul.mubr.bf16.gmra.mrb[16].mxu1 %v91_v61 }
  0x4b   :  { %462 = vmatprep.mubr.bf16.mxu1 %v94_v63  ;;  %1866 = vmatpush3.bf16.msra.mxu1 %v2008_v2 }
  0x4c   :  { %1867 = vmatprep.subr.bf16.mxu1 %v2079_v0  ;;  %1904 = vmatpush3.bf16.msra.mxu0 %v2025_v17 }
  0x4f   :  { %1868 = vmatpush3.bf16.msra.mxu1 %v2009_v3 }
  0x50   :  { %1869 = vmatprep.subr.bf16.mxu1 %v2079_v0 }
  0x52   :  { %463 = vmatmul.mubr.bf16.gmra.mrb[20].mxu1 %v93_v62 }
  0x53   :  { %1870 = vmatpush3.bf16.msra.mxu1 %v2010_v4  ;;  %1877 = vmatprep.mubr.msk.bf16.mxu1 %vm2080_vm2, %v2079_v0 }
  0x54   :  { %1871 = vmatprep.subr.bf16.mxu1 %v2079_v0 }
  0x57   :  { %1872 = vmatpush3.bf16.msra.mxu1 %v2012_v6 }
  0x58   :  { %1873 = vmatprep.subr.bf16.mxu1 %v2079_v0 }
  0x5b   :  { %1874 = vmatpush3.bf16.msra.mxu1 %v2014_v8 }
  0x5c   :  { %1875 = vmatprep.subr.bf16.mxu1 %v2079_v0 }
  0x5f   :  { %1876 = vmatpush3.bf16.msra.mxu1 %v2016_v10 }
  0x60   :  { %1917 = vmatprep.subr.bf16.mxu1 %v2079_v0 }
  0x94   :  { %v2507_v44 = vpop.permute.xlu0 %685  ;;  %v2514_v16 = vpop.permute.xlu1 %695 }
  0x98   :  { %v2512_v15 = vpop.permute.xlu0 %690 }
  0xf5   :  { %v1742_v18 = vpop.f32.mrb[0].mxu1 }
  0xf6   :  { %v1743_v19 = vpop.f32.mrb[1].mxu1 }
  0xf7   :  { %v1744_v20 = vadd.f32 %v1743_v19, %v1742_v18  ;;  %v1745_v21 = vpop.f32.mrb[2].mxu1 }
  0xf8   :  { %v1746_v22 = vpop.f32.mrb[3].mxu1 }
  0xf9   :  { %v1747_v23 = vadd.f32 %v1746_v22, %v1745_v21  ;;  %v2018_v22 = vld [vmem:[%s2765_s4 + $0x80] sm:$0xff]  }
  0xfa   :  { %v1810_v41 = vpop.f32.mrb[0].mxu0 }
  0xfb   :  { %v1811_v42 = vpop.f32.mrb[1].mxu0 }
  0xfc   :  { %v1812_v26 = vadd.f32 %v1811_v42, %v1810_v41  ;;  %v1813_v43 = vpop.f32.mrb[2].mxu0 }
  0xfd   :  { %v1748_v25 = vpop.f32.mrb[4].mxu1  ;;  %v1814_v46 = vpop.f32.mrb[3].mxu0 }
  0xfe   :  { %v1749_v27 = vpop.f32.mrb[5].mxu1  ;;  %v1815_v47 = vadd.f32 %v1814_v46, %v1813_v43  ;;  %v2020_v43 = vld [vmem:[%s2765_s4 + $0x88] sm:$0xff]  }
  0xff   :  { %v1750_v29 = vadd.f32 %v1749_v27, %v1748_v25  ;;  %v1751_v31 = vpop.f32.mrb[6].mxu1 }
 0x100   :  { %v1752_v32 = vpop.f32.mrb[7].mxu1 }
 0x101   :  { %v1753_v33 = vadd.f32 %v1752_v32, %v1751_v31 }
 0x102   :  { %v1816_v37 = vpop.f32.mrb[4].mxu0 }
 0x103   :  { %v1817_v48 = vpop.f32.mrb[5].mxu0 }
 0x104   :  { %v1818_v50 = vadd.f32 %v1817_v48, %v1816_v37  ;;  %v1819_v51 = vpop.f32.mrb[6].mxu0 }
 0x105   :  { %v1754_v34 = vpop.f32.mrb[8].mxu1  ;;  %v1820_v55 = vpop.f32.mrb[7].mxu0 }
 0x106   :  { %v1755_v35 = vpop.f32.mrb[9].mxu1  ;;  %v1821_v30 = vadd.f32 %v1820_v55, %v1819_v51 }
 0x107   :  { %v2502_v36 = vadd.f32 %v1755_v35, %v1754_v34  ;;  %v1757_v39 = vpop.f32.mrb[10].mxu1 }
 0x108   :  { %v1758_v40 = vpop.f32.mrb[11].mxu1 }
 0x10a   :  { %v1822_v45 = vpop.f32.mrb[8].mxu0 }
 0x10b   :  { %v1823_v62 = vpop.f32.mrb[9].mxu0 }
 0x10c   :  { %v1824_v59 = vadd.f32 %v1823_v62, %v1822_v45  ;;  %v1825_v2 = vpop.f32.mrb[10].mxu0  ;;  %v2553_v45 = vpop.permute.xlu0 %705 }
 0x10d   :  { %v1826_v7 = vpop.f32.mrb[11].mxu0  ;;  %v2026_v2 = vld [vmem:[%s2765_s4 + $0xa0] sm:$0xff]  }
 0x115   :  { %v1776_v38 = vpop.f32.mrb[12].mxu1 }
 0x116   :  { %v1777_v49 = vpop.f32.mrb[13].mxu1 }
 0x117   :  { %v1778_v52 = vadd.f32 %v1777_v49, %v1776_v38  ;;  %v1779_v53 = vpop.f32.mrb[14].mxu1 }
 0x118   :  { %v1780_v12 = vpop.f32.mrb[15].mxu1 }
 0x119   :  { %v449_v56 = vadd.f32 %v1778_v52, %v1744_v20  ;;  %v1781_v58 = vadd.f32 %v1780_v12, %v1779_v53  ;;  %v2022_v52 = vld [vmem:[%s2765_s4 + $0x90] sm:$0xff]  }
 0x11b   :  { %v661_v54 = vadd.f32 %v1812_v26, %v449_v56  ;;  %v452_v60 = vadd.f32 %v1781_v58, %v1747_v23  ;;  %v2529_v26 = vpop.permute.xlu1 %700 }
 0x11d   :  { %v673_v61 = vadd.f32 %v1620_v13, %v661_v54  ;;  %v662_v63 = vadd.f32 %v1815_v47, %v452_v60  ;;  %v1782_v24 = vpop.f32.mrb[16].mxu1 }
 0x11e   :  { %v1783_v57 = vpop.f32.mrb[17].mxu1 }
 0x11f   :  { %v678_v3 = vmax.f32 %v673_v61, 0.0  ;;  %v674_v4 = vadd.f32 %v1620_v13, %v662_v63  ;;  %v1784_v5 = vadd.f32 %v1783_v57, %v1782_v24  ;;  %v1785_v6 = vpop.f32.mrb[18].mxu1  ;;  %v2024_v61 = vld [vmem:[%s2765_s4 + $0x98] sm:$0xff]  }
 0x120   :  { %v1786_v8 = vpop.f32.mrb[19].mxu1 }
 0x121   :  { %v2510_v9 = vmul.f32 %v2507_v44, %v678_v3  ;;  %v679_v10 = vmax.f32 %v674_v4, 0.0  ;;  %v457_v11 = vadd.f32 %v1784_v5, %v1750_v29  ;;  %v1787_v14 = vadd.f32 %v1786_v8, %v1785_v6 }
 0x123   :  { %v709_v17 = vmul.f32 %v2512_v15, %v679_v10  ;;  %v460_v18 = vadd.f32 %v1787_v14, %v1753_v33  ;;  %v713_v19 = vrot.slane %v2510_v9, 7  ;;  %v723_v20 = vrot.slane %v2510_v9, 1  ;;  %v2028_v10 = vld [vmem:[%s2765_s4 + $0xb0] sm:$0xff]  }
 0x124   :  { %v663_v21 = vadd.f32 %v1818_v50, %v457_v11  ;;  %v2029_v11 = vld [vmem:[%s2765_s4 + $0xb8] sm:$0xff]  }
 0x125   :  { %v714_v23 = vrot.slane %v709_v17, 7  ;;  %v724_v25 = vrot.slane %v709_v17, 1  ;;  %v752_v27 = vpack.c.bf16 %v709_v17, %v2510_v9  ;;  %v664_v29 = vadd.f32 %v1821_v30, %v460_v18  ;;  %v1788_v31 = vpop.f32.mrb[20].mxu1  ;;  %v2027_v9 = vld [vmem:[%s2765_s4 + $0xa8] sm:$0xff]  }
 0x126   :  { %v675_v32 = vadd.f32 %v1620_v13, %v663_v21  ;;  %v1789_v34 = vpop.f32.mrb[21].mxu1  ;;  %v2032_v18 = vld [vmem:[%s2767_s6 + $0x84] ss:$8 sps:$4 sm:$0xff]   ;;  %v2035_v21 = vld [vmem:[%s2767_s6 + $0x94] ss:$8 sps:$4 sm:$0xff]  }
 0x127   :  { %v721_v33 = vsel %vm57_vm1, %v713_v19, %v714_v23  ;;  %v2527_v35 = vsel %vm78_vm0, %v723_v20, %v724_v25  ;;  %v1790_v39 = vadd.f32 %v1789_v34, %v1788_v31  ;;  %1878 = vmatmul.mubr.bf16.vlgmr.msra.gmra.mrb[24].mxu1 %v752_v27  ;;  %v676_v40 = vadd.f32 %v1620_v13, %v664_v29  ;;  %v1791_v41 = vpop.f32.mrb[22].mxu1  ;;  %v2044_v27 = vld [vmem:[%s2767_s6 + $0xc4] ss:$8 sps:$4 sm:$0xff]   ;;  %v2042_v29 = vld [vmem:[%s2767_s6 + $0xc0] ss:$8 sps:$4 sm:$0xff]  }
 0x128   :  { %v680_v42 = vmax.f32 %v675_v32, 0.0  ;;  %1918 = vmatpush3.bf16.msra.mxu1 %v2018_v22  ;;  %v1792_v46 = vpop.f32.mrb[23].mxu1  ;;  %1881 = vmatprep.mubr.msk.bf16.mxu1 %vm2080_vm2, %v2079_v0  ;;  %v2036_v22 = vld [vmem:[%s2767_s6 + $0xa0] ss:$8 sps:$4 sm:$0xff]   ;;  %v2047_v31 = vld [vmem:[%s2767_s6 + $0xd4] ss:$8 sps:$4 sm:$0xff]  }
 0x129   :  { %v465_v47 = vadd.f32 %v1790_v39, %v2502_v36  ;;  %v681_v37 = vmax.f32 %v676_v40, 0.0  ;;  %1919 = vmatprep.subr.bf16.mxu1 %v2079_v0  ;;  %1260 = vmatprep.subr.bf16.mxu0 %v2032_v18  ;;  %v2045_v32 = vld [vmem:[%s2767_s6 + $0xd0] ss:$8 sps:$4 sm:$0xff]   ;;  %v2050_v34 = vld [vmem:[%s2767_s6 + $0xe4] ss:$8 sps:$4 sm:$0xff]  }
 0x12a   :  { %v710_v38 = vmul.f32 %v2514_v16, %v680_v42  ;;  %v2051_v39 = vld [vmem:[%s2767_s6 + $0xf0] ss:$8 sps:$4 sm:$0xff]   ;;  %v2056_v40 = vld [vmem:[%s2767_s6 + $0x4] ss:$8 sps:$4 sm:$0xff]  }
 0x12b   :  { %v665_v48 = vadd.f32 %v1824_v59, %v465_v47  ;;  %v711_v49 = vmul.f32 %v2529_v26, %v681_v37 }
 0x12c   :  { %v715_v50 = vrot.slane %v710_v38, 7  ;;  %v725_v51 = vrot.slane %v710_v38, 1  ;;  %1920 = vmatpush3.bf16.msra.mxu1 %v2020_v43 }
 0x12d   :  { %v677_v53 = vadd.f32 %v1620_v13, %v665_v48  ;;  %v716_v55 = vrot.slane %v711_v49, 7  ;;  %v726_v12 = vrot.slane %v711_v49, 1  ;;  %1921 = vmatprep.subr.bf16.mxu1 %v2079_v0  ;;  %v753_v36 = vpack.c.bf16 %v711_v49, %v710_v38 }
 0x12e   :  { %v730_v30 = vsel %vm78_vm0, %v724_v25, %v725_v51  ;;  %v720_v56 = vsel %vm57_vm1, %v714_v23, %v715_v50  ;;  %v2041_v23 = vld [vmem:[%s2767_s6 + $0xb4] ss:$8 sps:$4 sm:$0xff]   ;;  %v2039_v25 = vld [vmem:[%s2767_s6 + $0xb0] ss:$8 sps:$4 sm:$0xff]  }
 0x12f   :  { %v980_v58 = vpack.c.bf16 %v730_v30, %v2527_v35  ;;  %v682_v54 = vmax.f32 %v677_v53, 0.0  ;;  %1882 = vmatmul.mubr.bf16.gmra.mrb[28].mxu1 %v753_v36  ;;  %v719_v60 = vsel %vm57_vm1, %v715_v50, %v716_v55  ;;  %v729_v13 = vsel %vm78_vm0, %v725_v51, %v726_v12  ;;  %v2053_v35 = vld [vmem:[%s2767_s6 + $0xf4] ss:$8 sps:$4 sm:$0xff]  }
 0x130   :  { %1922 = vmatpush3.bf16.msra.mxu1 %v2022_v52  ;;  %1885 = vmatprep.mubr.msk.bf16.mxu1 %vm2080_vm2, %v2079_v0  ;;  %v734_v63 = vpack.c.bf16 %v719_v60, %v720_v56 }
 0x131   :  { %v712_v24 = vmul.f32 %v2553_v45, %v682_v54  ;;  %1923 = vmatprep.subr.bf16.mxu1 %v2079_v0 }
 0x133   :  { %v717_v62 = vrot.slane %v712_v24, 7  ;;  %v727_v57 = vrot.slane %v712_v24, 1  ;;  %v754_v59 = vpack.c.bf16 %v712_v24, %v712_v24 }
 0x134   :  { %1924 = vmatpush3.bf16.msra.mxu1 %v2024_v61 }
 0x135   :  { %1925 = vmatprep.subr.bf16.mxu1 %v2079_v0  ;;  %v722_v3 = vsel %vm57_vm1, %v717_v62, %v713_v19  ;;  %v718_v4 = vsel %vm57_vm1, %v716_v55, %v717_v62  ;;  %v728_v5 = vsel %vm78_vm0, %v726_v12, %v727_v57  ;;  %v732_v6 = vsel %vm78_vm0, %v727_v57, %v723_v20  ;;  %v2030_v19 = vld [vmem:[%s2767_s6 + $0x80] ss:$8 sps:$4 sm:$0xff]   ;;  %v2033_v20 = vld [vmem:[%s2767_s6 + $0x90] ss:$8 sps:$4 sm:$0xff]  }
 0x136   :  { %v733_v7 = vpack.c.bf16 %v721_v33, %v722_v3  ;;  %v981_v8 = vpack.c.bf16 %v728_v5, %v729_v13  ;;  %v735_v14 = vpack.c.bf16 %v718_v4, %v718_v4  ;;  %v982_v17 = vpack.c.bf16 %v732_v6, %v732_v6  ;;  %v2048_v33 = vld [vmem:[%s2767_s6 + $0xe0] ss:$8 sps:$4 sm:$0xff]  }
 0x137   :  { %1886 = vmatmul.mubr.bf16.gmra.mrb[32].mxu1 %v754_v59  ;;  %v1677_v62 = vld [vmem:[%s2768_s5] ss:$0 sm:$0xff] }
 0x138   :  { %1926 = vmatpush3.bf16.msra.mxu1 %v2026_v2  ;;  %1906 = vmatmul.mubr.bf16.vlgmr.msra.gmra.mrb[12].mxu0 %v733_v7 }
 0x139   :  { %1927 = vmatprep.subr.bf16.mxu1 %v2079_v0  ;;  %1909 = vmatprep.mubr.msk.bf16.mxu0 %vm2080_vm2, %v2079_v0 }
 0x13a   :  { %1933 = vmatprep.mubr.msk.bf16.mxu1 %vm2080_vm2, %v2079_v0  ;;  %1261 = vmatpush1.bf16.msra.mxu0 %v2030_v19 }
 0x13b   :  { %1262 = vmatprep.subr.bf16.mxu0 %v2035_v21 }
 0x13c   :  { %1928 = vmatpush3.bf16.msra.mxu1 %v2027_v9 }
 0x13d   :  { %1929 = vmatprep.subr.bf16.mxu1 %v2079_v0 }
 0x13e   :  { %1263 = vmatpush1.bf16.msra.mxu0 %v2033_v20 }
 0x140   :  { %1930 = vmatpush3.bf16.msra.mxu1 %v2028_v10  ;;  %1910 = vmatmul.mubr.bf16.gmra.mrb[16].mxu0 %v734_v63 }
 0x141   :  { %1931 = vmatprep.subr.bf16.mxu1 %v2079_v0  ;;  %1913 = vmatprep.mubr.msk.bf16.mxu0 %vm2080_vm2, %v2079_v0 }
 0x144   :  { %1932 = vmatpush3.bf16.msra.mxu1 %v2029_v11 }
 0x147   :  { %1934 = vmatmul.mubr.bf16.vlgmr.msra.gmra.mrb[36].mxu1 %v980_v58 }
 0x148   :  { %1914 = vmatmul.mubr.bf16.gmra.mrb[20].mxu0 %v735_v14  ;;  %1937 = vmatprep.mubr.msk.bf16.mxu1 %vm2080_vm2, %v2079_v0 }
 0x149   :  { %1292 = vmatprep.mubr.bf16.mxu0 %v2078_v1 }
 0x14f   :  { %1938 = vmatmul.mubr.bf16.gmra.mrb[40].mxu1 %v981_v8 }
 0x150   :  { %1941 = vmatprep.mubr.msk.bf16.mxu1 %vm2080_vm2, %v2079_v0  ;;  %v2038_v0 = vld [vmem:[%s2767_s6 + $0xa4] ss:$8 sps:$4 sm:$0xff]  }
 0x151   :  { %1264 = vmatprep.subr.bf16.mxu0 %v2038_v0 }
 0x152   :  { %1265 = vmatpush1.bf16.msra.mxu0 %v2036_v22 }
 0x153   :  { %1266 = vmatprep.subr.bf16.mxu0 %v2041_v23 }
 0x156   :  { %1267 = vmatpush1.bf16.msra.mxu0 %v2039_v25 }
 0x157   :  { %1942 = vmatmul.mubr.bf16.gmra.mrb[44].mxu1 %v982_v17  ;;  %1268 = vmatprep.subr.bf16.mxu0 %v2044_v27 }
 0x15a   :  { %1269 = vmatpush1.bf16.msra.mxu0 %v2042_v29 }
 0x15b   :  { %1270 = vmatprep.subr.bf16.mxu0 %v2047_v31 }
 0x15e   :  { %1271 = vmatpush1.bf16.msra.mxu0 %v2045_v32 }
 0x15f   :  { %1272 = vmatprep.subr.bf16.mxu0 %v2050_v34 }
 0x162   :  { %1273 = vmatpush1.bf16.msra.mxu0 %v2048_v33 }
 0x163   :  { %1274 = vmatprep.subr.bf16.mxu0 %v2053_v35 }
 0x166   :  { %1275 = vmatpush1.bf16.msra.mxu0 %v2051_v39 }
 0x167   :  { %1401 = vmatprep.subr.bf16.mxu0 %v2056_v40 }
 0x1fa   :  { %v854_v41 = vpop.f32.mrb[24].mxu1 }
 0x1fb   :  { %v1879_v42 = vpop.f32.mrb[25].mxu1 }
 0x1fc   :  { %v857_v43 = vpop.f32.mrb[26].mxu1 }
 0x1fd   :  { %v1880_v46 = vpop.f32.mrb[27].mxu1 }
 0x202   :  { %v862_v47 = vpop.f32.mrb[28].mxu1 }
 0x203   :  { %v1883_v37 = vpop.f32.mrb[29].mxu1 }
 0x204   :  { %v865_v38 = vpop.f32.mrb[30].mxu1 }
 0x205   :  { %v1884_v48 = vpop.f32.mrb[31].mxu1 }
 0x20a   :  { %v870_v49 = vpop.f32.mrb[32].mxu1 }
 0x20b   :  { %v1887_v50 = vpop.f32.mrb[33].mxu1  ;;  %v958_v51 = vpop.f32.mrb[12].mxu0 }
 0x20c   :  { %v959_v52 = vadd.f32 %v958_v51, %v854_v41  ;;  %v873_v53 = vpop.f32.mrb[34].mxu1  ;;  %v1907_v55 = vpop.f32.mrb[13].mxu0  ;;  %v2059_v51 = vld [vmem:[%s2767_s6 + $0x14] ss:$8 sps:$4 sm:$0xff]  }
 0x20d   :  { %v1888_v12 = vpop.f32.mrb[35].mxu1  ;;  %v961_v36 = vpop.f32.mrb[14].mxu0  ;;  %v2057_v55 = vld [vmem:[%s2767_s6 + $0x10] ss:$8 sps:$4 sm:$0xff]  }
 0x20e   :  { %v962_v30 = vadd.f32 %v961_v36, %v857_v43  ;;  %v1908_v56 = vpop.f32.mrb[15].mxu0  ;;  %v2062_v12 = vld [vmem:[%s2767_s6 + $0x24] ss:$8 sps:$4 sm:$0xff]  }
 0x213   :  { %v966_v58 = vpop.f32.mrb[16].mxu0 }
 0x214   :  { %v967_v54 = vadd.f32 %v966_v58, %v862_v47  ;;  %v1911_v60 = vpop.f32.mrb[17].mxu0 }
 0x215   :  { %v969_v13 = vpop.f32.mrb[18].mxu0  ;;  %v2063_v60 = vld [vmem:[%s2767_s6 + $0x30] ss:$8 sps:$4 sm:$0xff]  }
 0x216   :  { %v970_v61 = vadd.f32 %v969_v13, %v865_v38  ;;  %v1912_v63 = vpop.f32.mrb[19].mxu0  ;;  %v2068_v13 = vld [vmem:[%s2767_s6 + $0x44] ss:$8 sps:$4 sm:$0xff]  }
 0x21a   :  { %v1082_v24 = vpop.f32.mrb[36].mxu1 }
 0x21b   :  { %v1104_v57 = vadd.f32 %v1082_v24, %v959_v52  ;;  %v1935_v59 = vpop.f32.mrb[37].mxu1  ;;  %v974_v2 = vpop.f32.mrb[20].mxu0  ;;  %v2071_v24 = vld [vmem:[%s2767_s6 + $0x54] ss:$8 sps:$4 sm:$0xff]  }
 0x21c   :  { %v975_v3 = vadd.f32 %v974_v2, %v870_v49  ;;  %v1085_v4 = vpop.f32.mrb[38].mxu1  ;;  %v1915_v5 = vpop.f32.mrb[21].mxu0  ;;  %v2054_v49 = vld [vmem:[%s2767_s6] ss:$8 sps:$4 sm:$0xff]   ;;  %v2077_v2 = vld [vmem:[%s2767_s6 + $0x74] ss:$8 sps:$4 sm:$0xff]  }
 0x21d   :  { %v1116_v6 = vadd.f32 %v1677_v62, %v1104_v57  ;;  %v1105_v7 = vadd.f32 %v1085_v4, %v962_v30  ;;  %v1936_v8 = vpop.f32.mrb[39].mxu1  ;;  %v977_v9 = vpop.f32.mrb[22].mxu0  ;;  %v2060_v30 = vld [vmem:[%s2767_s6 + $0x20] ss:$8 sps:$4 sm:$0xff]   ;;  %v2074_v57 = vld [vmem:[%s2767_s6 + $0x64] ss:$8 sps:$4 sm:$0xff]  }
 0x21e   :  { %v1916_v10 = vpop.f32.mrb[23].mxu0  ;;  %v2072_v59 = vld [vmem:[%s2767_s6 + $0x60] ss:$8 sps:$4 sm:$0xff]   ;;  %v1466_v9 = vsub.s32 0, %v2213_v28 }
 0x21f   :  { %v1121_v11 = vmax.f32 %v1116_v6, 0.0  ;;  %v1117_v14 = vadd.f32 %v1677_v62, %v1105_v7  ;;  %v1462_v10 = vld [vmem:[%s2769_s7] sm:$0x3] }
 0x221   :  { %v2652_v17 = vmul.f32 %v1121_v11, %v2507_v44  ;;  %v1122_v18 = vmax.f32 %v1117_v14, 0.0  ;;  %v1470_v11 = vsub.s32 1, %v2213_v28  ;;  %v1467_v14 = vrot.slane %v1462_v10, %v1466_v9 }
 0x222   :  { %v1090_v19 = vpop.f32.mrb[40].mxu1 }
 0x223   :  { %v2655_v20 = vmul.f32 %v1122_v18, %v2512_v15  ;;  %v1106_v21 = vadd.f32 %v1090_v19, %v967_v54  ;;  %v1939_v0 = vpop.f32.mrb[41].mxu1  ;;  %v1131_v22 = vrot.slane %v2652_v17, 1  ;;  %v2065_v54 = vld [vmem:[%s2767_s6 + $0x34] ss:$8 sps:$4 sm:$0xff]  }
 0x224   :  { %v1093_v23 = vpop.f32.mrb[42].mxu1 }
 0x225   :  { %v1132_v25 = vrot.slane %v2655_v20, 1  ;;  %v1141_v27 = vpack.c.bf16 %v2655_v20, %v2652_v17  ;;  %v1118_v29 = vadd.f32 %v1677_v62, %v1106_v21  ;;  %v1107_v31 = vadd.f32 %v1093_v23, %v970_v61  ;;  %v1940_v32 = vpop.f32.mrb[43].mxu1  ;;  %v2066_v61 = vld [vmem:[%s2767_s6 + $0x40] ss:$8 sps:$4 sm:$0xff]  }
 0x226   :  { %v1471_v17 = vrot.slane %v1462_v10, %v1470_v11 }
 0x227   :  { %v1139_v44 = vsel %vm78_vm0, %v1131_v22, %v1132_v25  ;;  %v1123_v34 = vmax.f32 %v1118_v29, 0.0  ;;  %v1119_v33 = vadd.f32 %v1677_v62, %v1107_v31 }
 0x229   :  { %v1128_v15 = vmul.f32 %v1123_v34, %v2514_v16  ;;  %v1124_v35 = vmax.f32 %v1119_v33, 0.0 }
 0x22a   :  { %v1098_v39 = vpop.f32.mrb[44].mxu1 }
 0x22b   :  { %v1133_v40 = vrot.slane %v1128_v15, 1  ;;  %v1129_v41 = vmul.f32 %v1124_v35, %v2529_v26  ;;  %v1108_v42 = vadd.f32 %v1098_v39, %v975_v3  ;;  %v1943_v43 = vpop.f32.mrb[45].mxu1  ;;  %v2075_v3 = vld [vmem:[%s2767_s6 + $0x70] ss:$8 sps:$4 sm:$0xff]  }
 0x22c   :  { %v1101_v46 = vpop.f32.mrb[46].mxu1 }
 0x22d   :  { %v1138_v47 = vsel %vm78_vm0, %v1132_v25, %v1133_v40  ;;  %v1134_v37 = vrot.slane %v1129_v41, 1  ;;  %v1120_v38 = vadd.f32 %v1677_v62, %v1108_v42  ;;  %v1944_v48 = vpop.f32.mrb[47].mxu1  ;;  %v1142_v50 = vpack.c.bf16 %v1129_v41, %v1128_v15  ;;  %v2069_v62 = vld [vmem:[%s2767_s6 + $0x50] ss:$8 sps:$4 sm:$0xff]  }
 0x22e   :  { %v1160_v16 = vpack.c.bf16 %v1138_v47, %v1139_v44 }
 0x22f   :  { %v1125_v26 = vmax.f32 %v1120_v38, 0.0  ;;  %v1137_v52 = vsel %vm78_vm0, %v1133_v40, %v1134_v37 }
 0x230   :  { %1293 = vmatmul.mubr.bf16.vlgmr.msra.gmra.mrb[24].mxu0 %v1160_v16 }
 0x231   :  { %v1130_v53 = vmul.f32 %v1125_v26, %v2553_v45  ;;  %1402 = vmatpush1.bf16.msra.mxu0 %v2054_v49  ;;  %1302 = vmatprep.mubr.bf16.mxu0 %v2078_v1 }
 0x232   :  { %1403 = vmatprep.subr.bf16.mxu0 %v2059_v51 }
 0x233   :  { %v1135_v36 = vrot.slane %v1130_v53, 1  ;;  %v1143_v4 = vpack.c.bf16 %v1130_v53, %v1130_v53 }
 0x235   :  { %1404 = vmatpush1.bf16.msra.mxu0 %v2057_v55  ;;  %v1136_v45 = vsel %vm78_vm0, %v1134_v37, %v1135_v36  ;;  %v1140_v56 = vsel %vm78_vm0, %v1135_v36, %v1131_v22 }
 0x236   :  { %1405 = vmatprep.subr.bf16.mxu0 %v2062_v12  ;;  %v1161_v58 = vpack.c.bf16 %v1136_v45, %v1137_v52  ;;  %v1162_v63 = vpack.c.bf16 %v1140_v56, %v1140_v56 }
 0x238   :  { %1303 = vmatmul.mubr.bf16.gmra.mrb[28].mxu0 %v1161_v58 }
 0x239   :  { %1406 = vmatpush1.bf16.msra.mxu0 %v2060_v30  ;;  %1312 = vmatprep.mubr.bf16.mxu0 %v2078_v1 }
 0x23a   :  { %1407 = vmatprep.subr.bf16.mxu0 %v2065_v54 }
 0x23d   :  { %1408 = vmatpush1.bf16.msra.mxu0 %v2063_v60 }
 0x23e   :  { %1409 = vmatprep.subr.bf16.mxu0 %v2068_v13 }
 0x240   :  { %1313 = vmatmul.mubr.bf16.gmra.mrb[32].mxu0 %v1162_v63 }
 0x241   :  { %1410 = vmatpush1.bf16.msra.mxu0 %v2066_v61  ;;  %1433 = vmatprep.mubr.bf16.mxu0 %v2078_v1 }
 0x242   :  { %1411 = vmatprep.subr.bf16.mxu0 %v2071_v24 }
 0x245   :  { %1412 = vmatpush1.bf16.msra.mxu0 %v2069_v62 }
 0x246   :  { %1413 = vmatprep.subr.bf16.mxu0 %v2074_v57 }
 0x249   :  { %1414 = vmatpush1.bf16.msra.mxu0 %v2072_v59 }
 0x24a   :  { %1415 = vmatprep.subr.bf16.mxu0 %v2077_v2 }
 0x24d   :  { %1416 = vmatpush1.bf16.msra.mxu0 %v2075_v3 }
 0x250   :  { %1434 = vmatmul.mubr.bf16.vlgmr.msra.gmra.mrb[24].mxu0 %v1141_v27 }
 0x251   :  { %1443 = vmatprep.mubr.bf16.mxu0 %v2078_v1 }
 0x258   :  { %1444 = vmatmul.mubr.bf16.gmra.mrb[28].mxu0 %v1142_v50 }
 0x259   :  { %1453 = vmatprep.mubr.bf16.mxu0 %v2078_v1 }
 0x260   :  { %1454 = vmatmul.mubr.bf16.gmra.mrb[36].mxu0 %v1143_v4 }
 0x313   :  { %v1314_v5 = vpop.f32.mrb[32].mxu0 }
 0x314   :  { %v1316_v6 = vpop.f32.mrb[33].mxu0 }
 0x315   :  { %v1318_v7 = vpop.f32.mrb[34].mxu0 }
 0x316   :  { %v1319_v8 = vpop.f32.mrb[35].mxu0 }
 0x323   :  { %v1435_v18 = vpop.f32.mrb[24].mxu0 }
 0x324   :  { %v1474_v19 = vadd.f32 %v1467_v14, %v1435_v18  ;;  %v1437_v20 = vpop.f32.mrb[25].mxu0 }
 0x325   :  { %v1475_v1 = vadd.f32 %v1471_v17, %v1437_v20  ;;  %v1439_v21 = vpop.f32.mrb[26].mxu0 }
 0x326   :  { %v1484_v0 = vmax.f32 %v1474_v19, 0.0  ;;  %v1476_v22 = vadd.f32 %v1467_v14, %v1439_v21  ;;  %v1441_v23 = vpop.f32.mrb[27].mxu0 }
 0x327   :  { %v1485_v25 = vmax.f32 %v1475_v1, 0.0  ;;  %v1477_v27 = vadd.f32 %v1471_v17, %v1441_v23 }
 0x328   :  { %1494 = vst [vmem:[%s2770_s8] sm:$0xff] %v1484_v0  ;;  %v1486_v29 = vmax.f32 %v1476_v22, 0.0 }
 0x329   :  { %1495 = vst [vmem:[%s2770_s8 + $0x8] sm:$0xff] %v1485_v25  ;;  %v1487_v28 = vmax.f32 %v1477_v27, 0.0 }
 0x32a   :  { %1496 = vst [vmem:[%s2770_s8 + $0x10] sm:$0xff] %v1486_v29 }
 0x32b   :  { %1497 = vst [vmem:[%s2770_s8 + $0x18] sm:$0xff] %v1487_v28  ;;  %v1445_v31 = vpop.f32.mrb[28].mxu0 }
 0x32c   :  { %v1478_v32 = vadd.f32 %v1467_v14, %v1445_v31  ;;  %v1447_v44 = vpop.f32.mrb[29].mxu0 }
 0x32d   :  { %v1479_v34 = vadd.f32 %v1471_v17, %v1447_v44  ;;  %v1449_v33 = vpop.f32.mrb[30].mxu0 }
 0x32e   :  { %v1488_v15 = vmax.f32 %v1478_v32, 0.0  ;;  %v1480_v35 = vadd.f32 %v1467_v14, %v1449_v33  ;;  %v1451_v39 = vpop.f32.mrb[31].mxu0 }
 0x32f   :  { %v1489_v40 = vmax.f32 %v1479_v34, 0.0  ;;  %v1481_v41 = vadd.f32 %v1471_v17, %v1451_v39 }
 0x330   :  { %1498 = vst [vmem:[%s2770_s8 + $0x20] sm:$0xff] %v1488_v15  ;;  %v1490_v42 = vmax.f32 %v1480_v35, 0.0 }
 0x331   :  { %1499 = vst [vmem:[%s2770_s8 + $0x28] sm:$0xff] %v1489_v40  ;;  %v1491_v43 = vmax.f32 %v1481_v41, 0.0 }
 0x332   :  { %1500 = vst [vmem:[%s2770_s8 + $0x30] sm:$0xff] %v1490_v42 }
 0x333   :  { %1501 = vst [vmem:[%s2770_s8 + $0x38] sm:$0xff] %v1491_v43  ;;  %v1455_v46 = vpop.f32.mrb[36].mxu0 }
 0x334   :  { %v1456_v47 = vadd.f32 %v1455_v46, %v1314_v5  ;;  %v1457_v37 = vpop.f32.mrb[37].mxu0 }
 0x335   :  { %v1458_v38 = vadd.f32 %v1457_v37, %v1316_v6  ;;  %v1459_v48 = vpop.f32.mrb[38].mxu0 }
 0x336   :  { %v1482_v49 = vadd.f32 %v1467_v14, %v1456_v47  ;;  %v1460_v50 = vpop.f32.mrb[39].mxu0 }
 0x337   :  { %v1483_v16 = vadd.f32 %v1471_v17, %v1458_v38 }
 0x338   :  { %v1492_v51 = vmax.f32 %v1482_v49, 0.0 }
 0x339   :  { %v1493_v26 = vmax.f32 %v1483_v16, 0.0 }
 0x33a   :  { %1502 = vst [vmem:[%s2770_s8 + $0x40] sm:$0x3] %v1492_v51 }
 0x33b   :  { %1503 = vst [vmem:[%s2770_s8 + $0x48] sm:$0x3] %v1493_v26 }

</bundles_post_ra>
